<compile_context>
chip_gen: v6e
topology: v6e:2x2x1
jax: 0.10.0
libtpu: 0.0.40
codegen_flags: <defaults>
</compile_context>

<pallas_src>
import itertools
from functools import partial

import jax
import jax.numpy as jnp
import numpy as np
from jax.experimental import pallas as pl
from jax.experimental.pallas import tpu as pltpu

CLASS_WEIGHT = 1.0
COORD_WEIGHT = 1.0
FOCAL_ALPHA = 0.25
FOCAL_GAMMA = 2.0  # exploited as explicit squaring inside the kernel


def _cost_kernel(logits_ref, pts_ref, tgt_ref, c_ref):
    """Computes one (T_pad8, tile_n) block of the transposed cost matrix C^T."""
    # --- focal-style classification cost (class 0 only), mean over ctrl pts ---
    prob = jax.nn.sigmoid(logits_ref[...])                         # (P, tile_n)
    one_m = 1.0 - prob
    # gamma == 2.0 -> explicit squaring; keep the reference's +1e-8 epsilon.
    neg = (1.0 - FOCAL_ALPHA) * (prob * prob) * (-jnp.log(one_m + 1e-8))
    pos = FOCAL_ALPHA * (one_m * one_m) * (-jnp.log(prob + 1e-8))
    cost_class = jnp.mean(pos - neg, axis=0, keepdims=True)        # (1, tile_n)

    # --- pairwise L1 distance (cdist, p=1), transposed & lane-dense over N ---
    y = tgt_ref[...]                                               # (T_pad8, D)
    t_pad, d_dim = y.shape
    tile_n = pts_ref.shape[1]

    # Two independent partial accumulators break the sub->abs->add chain (ILP);
    # query rows are read per-d from the ref so only one row is live at a time.
    acc0 = jnp.zeros((t_pad, tile_n), jnp.float32)
    acc1 = jnp.zeros((t_pad, tile_n), jnp.float32)
    for d in range(0, d_dim - 1, 2):
        acc0 = acc0 + jnp.abs(y[:, d:d + 1] - pts_ref[d:d + 1, :])
        acc1 = acc1 + jnp.abs(y[:, d + 1:d + 2] - pts_ref[d + 1:d + 2, :])
    if d_dim % 2:
        acc0 = acc0 + jnp.abs(y[:, d_dim - 1:d_dim] - pts_ref[d_dim - 1:d_dim, :])
    cdist = acc0 + acc1                                            # (T_pad8, tile_n)

    c_ref[...] = (CLASS_WEIGHT * cost_class + COORD_WEIGHT * cdist).astype(c_ref.dtype)


def _round_up(x, m):
    return -(-x // m) * m


def _num_tensorcores():
    """TensorCores per chip: megacore gens (v4 / v7x) get a forced even grid split."""
    try:
        kind = jax.devices()[0].device_kind.lower()
    except Exception:
        return 1
    return 2 if ("v7" in kind or "v4" in kind) else 1


def _choose_tiling(n, t, max_tile=1024):
    """Pick (N_pad, tile_n, T_pad8) for the transposed layout."""
    n_lanes = _round_up(max(n, 1), 128)
    steps = _round_up(n_lanes, max_tile) // max_tile          # ceil(n_lanes / max_tile)
    if _num_tensorcores() > 1 and n_lanes >= 256:
        # even number of grid steps so both TensorCores get equal lane ranges
        steps = _round_up(max(steps, 2), 2)
    tile_n = _round_up(-(-n_lanes // steps), 128)
    n_pad = steps * tile_n
    t_pad = _round_up(max(t, 1), 8)
    return n_pad, tile_n, t_pad


@partial(jax.jit, static_argnames=("tile_n", "n_pad", "t_pad"))
def _cost_matrix_device(logits0, out_pts, tgt_pts, *, tile_n, n_pad, t_pad):
    """Single fused executable: casts + pads + transposes + pallas_call.

    Returns the padded, transposed cost matrix CT of shape (t_pad, n_pad).
    """
    N, P = logits0.shape
    D = out_pts.shape[1]
    T = tgt_pts.shape[0]

    # Cast to f32 up-front so (8,128) tiling rules hold regardless of input dtype.
    logits0 = logits0.astype(jnp.float32)
    out_pts = out_pts.astype(jnp.float32)
    tgt_pts = tgt_pts.astype(jnp.float32)

    # Queries on the lane axis (pad N -> n_pad); targets on sublanes (pad T -> t_pad).
    logitsT = jnp.pad(jnp.transpose(logits0), ((0, 0), (0, n_pad - N)))   # (P, n_pad)
    ptsT = jnp.pad(jnp.transpose(out_pts), ((0, 0), (0, n_pad - N)))      # (D, n_pad)
    tgt = jnp.pad(tgt_pts, ((0, t_pad - T), (0, 0)))                      # (t_pad, D)

    return pl.pallas_call(
        _cost_kernel,
        out_shape=jax.ShapeDtypeStruct((t_pad, n_pad), jnp.float32),
        grid_spec=pltpu.PrefetchScalarGridSpec(
            num_scalar_prefetch=0,
            grid=(n_pad // tile_n,),
            in_specs=[
                pl.BlockSpec((P, tile_n), lambda i: (0, i)),
                pl.BlockSpec((D, tile_n), lambda i: (0, i)),
                # constant block (index never changes); pipeline skips the re-copy
                pl.BlockSpec((t_pad, D), lambda i: (0, 0)),
            ],
            out_specs=pl.BlockSpec((t_pad, tile_n), lambda i: (0, i)),
        ),
        compiler_params=pltpu.CompilerParams(dimension_semantics=("parallel",)),
    )(logitsT, ptsT, tgt)


def cost_matrix_pallas(logits0, out_pts, tgt_pts):
    """(N, P), (N, D), (T, D) -> padded transposed device cost matrix (t_pad, n_pad)."""
    N = logits0.shape[0]
    T = tgt_pts.shape[0]
    n_pad, tile_n, t_pad = _choose_tiling(N, T)
    return _cost_matrix_device(logits0, out_pts, tgt_pts,
                               tile_n=tile_n, n_pad=n_pad, t_pad=t_pad)


def cost_matrix_host(logits0, out_pts, tgt_pts):
    """Host-side (numpy) (N, T) cost matrix: transfer, then trim/transpose on host."""
    N = logits0.shape[0]
    T = tgt_pts.shape[0]
    CT = jax.block_until_ready(cost_matrix_pallas(logits0, out_pts, tgt_pts))
    return np.asarray(CT).T[:N, :T]


def _linear_sum_assignment(cost):
    # TODO(synk): Hungarian assignment has no Pallas equivalent (host-side, dynamic output size).
    try:
        from scipy.optimize import linear_sum_assignment
        r, c = linear_sum_assignment(cost)
        return np.asarray(r, dtype=np.int64), np.asarray(c, dtype=np.int64)
    except ImportError:
        # tiny-problem brute force fallback (n_rows >= n_cols, both small)
        n_rows, n_cols = cost.shape
        best, best_rows = None, None
        for rows in itertools.permutations(range(n_rows), n_cols):
            s = float(cost[list(rows), list(range(n_cols))].sum())
            if best is None or s < best:
                best, best_rows = s, rows
        order = np.argsort(np.asarray(best_rows))
        rows = np.asarray(best_rows)[order]
        cols = np.arange(n_cols)[order]
        return rows.astype(np.int64), cols.astype(np.int64)


def ctrl_point_detection_cost_matcher(outputs, targets):
    sizes = [int(v["ctrl_points"].shape[0]) for v in targets]
    bs, num_queries = outputs["pred_logits"].shape[:2]

    # glue: flatten batch/query dims, select class-0 logits, flatten ctrl points
    logits = outputs["pred_logits"]
    logits0 = logits.reshape(bs * num_queries, *logits.shape[2:])[..., 0]      # (N, P)
    out_pts = outputs["pred_ctrl_points"].reshape(bs * num_queries, -1)        # (N, D)

    total = sum(sizes)
    if total > 0:
        tgt_pts = jnp.concatenate(
            [v["ctrl_points"] for v in targets], axis=0
        ).reshape(total, -1)                                                   # (T, D)
        C = cost_matrix_host(logits0, out_pts, tgt_pts).reshape(bs, num_queries, total)
    else:
        C = np.zeros((bs, num_queries, 0), dtype=np.float32)

    indices = []
    col = 0
    for i, s in enumerate(sizes):
        if s > 0:
            indices.append(_linear_sum_assignment(C[i, :, col:col + s]))
        else:
            indices.append((np.array([], dtype=np.int64), np.array([], dtype=np.int64)))
        col += s
    return [(np.asarray(i, dtype=np.int64), np.asarray(j, dtype=np.int64)) for i, j in indices]


def _reference_cost_matrix(logits0, out_pts, tgt_pts):
    # pure-JAX reference of the hot path (mirrors PyTorch semantics exactly)
    prob = jax.nn.sigmoid(logits0.astype(jnp.float32))
    neg = (1.0 - FOCAL_ALPHA) * prob ** FOCAL_GAMMA * (-jnp.log(1.0 - prob + 1e-8))
    pos = FOCAL_ALPHA * (1.0 - prob) ** FOCAL_GAMMA * (-jnp.log(prob + 1e-8))
    cost_class = jnp.mean(pos - neg, axis=-1, keepdims=True)
    cdist = jnp.sum(jnp.abs(out_pts[:, None, :] - tgt_pts[None, :, :]), axis=-1)
    return CLASS_WEIGHT * cost_class + COORD_WEIGHT * cdist


if __name__ == "__main__":
    key = jax.random.PRNGKey(0)
    bs, num_queries, n_pts, num_classes = 2, 8, 8, 1
    k1, k2, k3, k4 = jax.random.split(key, 4)

    outputs = {
        "pred_logits": jax.random.normal(k1, (bs, num_queries, n_pts, num_classes), jnp.float32),
        "pred_ctrl_points": jax.random.uniform(k2, (bs, num_queries, n_pts, 2), jnp.float32),
    }
    targets = [
        {"ctrl_points": jax.random.uniform(k3, (3, n_pts, 2), jnp.float32)},
        {"ctrl_points": jax.random.uniform(k4, (2, n_pts, 2), jnp.float32)},
    ]

    # run the Pallas hot path once and sanity-check against pure-JAX reference
    logits0 = outputs["pred_logits"].reshape(bs * num_queries, n_pts, num_classes)[..., 0]
    out_pts = outputs["pred_ctrl_points"].reshape(bs * num_queries, -1)
    tgt_pts = jnp.concatenate([t["ctrl_points"] for t in targets], axis=0).reshape(5, -1)
    C_kernel = cost_matrix_host(logits0, out_pts, tgt_pts)
    C_ref = np.asarray(jax.block_until_ready(_reference_cost_matrix(logits0, out_pts, tgt_pts)))
    np.testing.assert_allclose(C_kernel, C_ref, rtol=1e-5, atol=1e-5)

    # full matcher forward (Pallas cost matrix + host Hungarian assignment)
    indices = ctrl_point_detection_cost_matcher(outputs, targets)
    assert len(indices) == bs
    assert all(len(r) == len(c) for r, c in indices)

    print("KERNEL_OK")
</pallas_src>

<mosaic_0001>
module attributes {stable_mosaic.version = 11 : i64} {
  func.func @_cost_kernel(%arg0: i32, %arg1: memref<8x128xf32, #tpu.memory_space<vmem>>, %arg2: memref<16x128xf32, #tpu.memory_space<vmem>>, %arg3: memref<8x16xf32, #tpu.memory_space<vmem>>, %arg4: memref<8x128xf32, #tpu.memory_space<vmem>>) attributes {dimension_semantics = [#tpu.dimension_semantics<parallel>], iteration_bounds = array<i64: 1>, scalar_prefetch = 0 : i64, scratch_operands = 0 : i64, tpu.core_type = #tpu.core_type<tc>, window_params = [{transform_indices = @transform_0, window_bounds = array<i64: 8, 128>}, {transform_indices = @transform_1, window_bounds = array<i64: 16, 128>}, {pipeline_mode = #tpu.pipeline_mode<synchronous>, transform_indices = @transform_2, window_bounds = array<i64: 8, 16>}, {transform_indices = @transform_3, window_bounds = array<i64: 8, 128>}]} {
    %c0 = arith.constant 0 : index
    %c0_0 = arith.constant 0 : index
    %0 = vector.load %arg1[%c0, %c0_0] : memref<8x128xf32, #tpu.memory_space<vmem>>, vector<8x128xf32>
    %1 = arith.negf %0 : vector<8x128xf32>
    %2 = math.exp %1 : vector<8x128xf32>
    %cst = arith.constant 1.000000e+00 : f32
    %3 = vector.broadcast %cst : f32 to vector<8x128xf32>
    %4 = arith.addf %3, %2 : vector<8x128xf32>
    %5 = arith.divf %3, %4 : vector<8x128xf32>
    %cst_1 = arith.constant 1.000000e+00 : f32
    %6 = vector.broadcast %cst_1 : f32 to vector<8x128xf32>
    %7 = arith.subf %6, %5 : vector<8x128xf32>
    %8 = arith.mulf %5, %5 : vector<8x128xf32>
    %cst_2 = arith.constant 7.500000e-01 : f32
    %9 = vector.broadcast %cst_2 : f32 to vector<8x128xf32>
    %10 = arith.mulf %9, %8 : vector<8x128xf32>
    %cst_3 = arith.constant 9.99999993E-9 : f32
    %11 = vector.broadcast %cst_3 : f32 to vector<8x128xf32>
    %12 = arith.addf %7, %11 : vector<8x128xf32>
    %13 = math.log %12 : vector<8x128xf32>
    %cst_4 = arith.constant 0.000000e+00 : f32
    %14 = vector.broadcast %cst_4 : f32 to vector<8x128xf32>
    %15 = arith.subf %14, %13 : vector<8x128xf32>
    %16 = arith.mulf %10, %15 : vector<8x128xf32>
    %17 = arith.mulf %7, %7 : vector<8x128xf32>
    %cst_5 = arith.constant 2.500000e-01 : f32
    %18 = vector.broadcast %cst_5 : f32 to vector<8x128xf32>
    %19 = arith.mulf %18, %17 : vector<8x128xf32>
    %cst_6 = arith.constant 9.99999993E-9 : f32
    %20 = vector.broadcast %cst_6 : f32 to vector<8x128xf32>
    %21 = arith.addf %5, %20 : vector<8x128xf32>
    %22 = math.log %21 : vector<8x128xf32>
    %cst_7 = arith.constant 0.000000e+00 : f32
    %23 = vector.broadcast %cst_7 : f32 to vector<8x128xf32>
    %24 = arith.subf %23, %22 : vector<8x128xf32>
    %25 = arith.mulf %19, %24 : vector<8x128xf32>
    %26 = arith.subf %25, %16 : vector<8x128xf32>
    %cst_8 = arith.constant dense<0.000000e+00> : vector<128xf32>
    %27 = vector.multi_reduction <add>, %26, %cst_8 [0] : vector<8x128xf32> to vector<128xf32>
    %28 = vector.shape_cast %27 : vector<128xf32> to vector<1x128xf32>
    %cst_9 = arith.constant 8.000000e+00 : f32
    %29 = vector.broadcast %cst_9 : f32 to vector<1x128xf32>
    %30 = arith.divf %28, %29 : vector<1x128xf32>
    %c0_10 = arith.constant 0 : index
    %c0_11 = arith.constant 0 : index
    %31 = vector.load %arg3[%c0_10, %c0_11] : memref<8x16xf32, #tpu.memory_space<vmem>>, vector<8x16xf32>
    %cst_12 = arith.constant 0.000000e+00 : f32
    %32 = vector.broadcast %cst_12 : f32 to vector<8x128xf32>
    %cst_13 = arith.constant 0.000000e+00 : f32
    %33 = vector.broadcast %cst_13 : f32 to vector<8x128xf32>
    %34 = vector.extract_strided_slice %31 {offsets = [0, 0], sizes = [8, 1], strides = [1, 1]} : vector<8x16xf32> to vector<8x1xf32>
    %c0_14 = arith.constant 0 : index
    %c0_15 = arith.constant 0 : index
    %35 = vector.load %arg2[%c0_14, %c0_15] : memref<16x128xf32, #tpu.memory_space<vmem>>, vector<1x128xf32>
    %36 = vector.broadcast %34 : vector<8x1xf32> to vector<8x128xf32>
    %37 = vector.broadcast %35 : vector<1x128xf32> to vector<8x128xf32>
    %38 = arith.subf %36, %37 : vector<8x128xf32>
    %39 = math.absf %38 : vector<8x128xf32>
    %40 = arith.addf %32, %39 : vector<8x128xf32>
    %41 = vector.extract_strided_slice %31 {offsets = [0, 1], sizes = [8, 1], strides = [1, 1]} : vector<8x16xf32> to vector<8x1xf32>
    %c1 = arith.constant 1 : index
    %c0_16 = arith.constant 0 : index
    %42 = vector.load %arg2[%c1, %c0_16] : memref<16x128xf32, #tpu.memory_space<vmem>>, vector<1x128xf32>
    %43 = vector.broadcast %41 : vector<8x1xf32> to vector<8x128xf32>
    %44 = vector.broadcast %42 : vector<1x128xf32> to vector<8x128xf32>
    %45 = arith.subf %43, %44 : vector<8x128xf32>
    %46 = math.absf %45 : vector<8x128xf32>
    %47 = arith.addf %33, %46 : vector<8x128xf32>
    %48 = vector.extract_strided_slice %31 {offsets = [0, 2], sizes = [8, 1], strides = [1, 1]} : vector<8x16xf32> to vector<8x1xf32>
    %c2 = arith.constant 2 : index
    %c0_17 = arith.constant 0 : index
    %49 = vector.load %arg2[%c2, %c0_17] : memref<16x128xf32, #tpu.memory_space<vmem>>, vector<1x128xf32>
    %50 = vector.broadcast %48 : vector<8x1xf32> to vector<8x128xf32>
    %51 = vector.broadcast %49 : vector<1x128xf32> to vector<8x128xf32>
    %52 = arith.subf %50, %51 : vector<8x128xf32>
    %53 = math.absf %52 : vector<8x128xf32>
    %54 = arith.addf %40, %53 : vector<8x128xf32>
    %55 = vector.extract_strided_slice %31 {offsets = [0, 3], sizes = [8, 1], strides = [1, 1]} : vector<8x16xf32> to vector<8x1xf32>
    %c3 = arith.constant 3 : index
    %c0_18 = arith.constant 0 : index
    %56 = vector.load %arg2[%c3, %c0_18] : memref<16x128xf32, #tpu.memory_space<vmem>>, vector<1x128xf32>
    %57 = vector.broadcast %55 : vector<8x1xf32> to vector<8x128xf32>
    %58 = vector.broadcast %56 : vector<1x128xf32> to vector<8x128xf32>
    %59 = arith.subf %57, %58 : vector<8x128xf32>
    %60 = math.absf %59 : vector<8x128xf32>
    %61 = arith.addf %47, %60 : vector<8x128xf32>
    %62 = vector.extract_strided_slice %31 {offsets = [0, 4], sizes = [8, 1], strides = [1, 1]} : vector<8x16xf32> to vector<8x1xf32>
    %c4 = arith.constant 4 : index
    %c0_19 = arith.constant 0 : index
    %63 = vector.load %arg2[%c4, %c0_19] : memref<16x128xf32, #tpu.memory_space<vmem>>, vector<1x128xf32>
    %64 = vector.broadcast %62 : vector<8x1xf32> to vector<8x128xf32>
    %65 = vector.broadcast %63 : vector<1x128xf32> to vector<8x128xf32>
    %66 = arith.subf %64, %65 : vector<8x128xf32>
    %67 = math.absf %66 : vector<8x128xf32>
    %68 = arith.addf %54, %67 : vector<8x128xf32>
    %69 = vector.extract_strided_slice %31 {offsets = [0, 5], sizes = [8, 1], strides = [1, 1]} : vector<8x16xf32> to vector<8x1xf32>
    %c5 = arith.constant 5 : index
    %c0_20 = arith.constant 0 : index
    %70 = vector.load %arg2[%c5, %c0_20] : memref<16x128xf32, #tpu.memory_space<vmem>>, vector<1x128xf32>
    %71 = vector.broadcast %69 : vector<8x1xf32> to vector<8x128xf32>
    %72 = vector.broadcast %70 : vector<1x128xf32> to vector<8x128xf32>
    %73 = arith.subf %71, %72 : vector<8x128xf32>
    %74 = math.absf %73 : vector<8x128xf32>
    %75 = arith.addf %61, %74 : vector<8x128xf32>
    %76 = vector.extract_strided_slice %31 {offsets = [0, 6], sizes = [8, 1], strides = [1, 1]} : vector<8x16xf32> to vector<8x1xf32>
    %c6 = arith.constant 6 : index
    %c0_21 = arith.constant 0 : index
    %77 = vector.load %arg2[%c6, %c0_21] : memref<16x128xf32, #tpu.memory_space<vmem>>, vector<1x128xf32>
    %78 = vector.broadcast %76 : vector<8x1xf32> to vector<8x128xf32>
    %79 = vector.broadcast %77 : vector<1x128xf32> to vector<8x128xf32>
    %80 = arith.subf %78, %79 : vector<8x128xf32>
    %81 = math.absf %80 : vector<8x128xf32>
    %82 = arith.addf %68, %81 : vector<8x128xf32>
    %83 = vector.extract_strided_slice %31 {offsets = [0, 7], sizes = [8, 1], strides = [1, 1]} : vector<8x16xf32> to vector<8x1xf32>
    %c7 = arith.constant 7 : index
    %c0_22 = arith.constant 0 : index
    %84 = vector.load %arg2[%c7, %c0_22] : memref<16x128xf32, #tpu.memory_space<vmem>>, vector<1x128xf32>
    %85 = vector.broadcast %83 : vector<8x1xf32> to vector<8x128xf32>
    %86 = vector.broadcast %84 : vector<1x128xf32> to vector<8x128xf32>
    %87 = arith.subf %85, %86 : vector<8x128xf32>
    %88 = math.absf %87 : vector<8x128xf32>
    %89 = arith.addf %75, %88 : vector<8x128xf32>
    %90 = vector.extract_strided_slice %31 {offsets = [0, 8], sizes = [8, 1], strides = [1, 1]} : vector<8x16xf32> to vector<8x1xf32>
    %c8 = arith.constant 8 : index
    %c0_23 = arith.constant 0 : index
    %91 = vector.load %arg2[%c8, %c0_23] : memref<16x128xf32, #tpu.memory_space<vmem>>, vector<1x128xf32>
    %92 = vector.broadcast %90 : vector<8x1xf32> to vector<8x128xf32>
    %93 = vector.broadcast %91 : vector<1x128xf32> to vector<8x128xf32>
    %94 = arith.subf %92, %93 : vector<8x128xf32>
    %95 = math.absf %94 : vector<8x128xf32>
    %96 = arith.addf %82, %95 : vector<8x128xf32>
    %97 = vector.extract_strided_slice %31 {offsets = [0, 9], sizes = [8, 1], strides = [1, 1]} : vector<8x16xf32> to vector<8x1xf32>
    %c9 = arith.constant 9 : index
    %c0_24 = arith.constant 0 : index
    %98 = vector.load %arg2[%c9, %c0_24] : memref<16x128xf32, #tpu.memory_space<vmem>>, vector<1x128xf32>
    %99 = vector.broadcast %97 : vector<8x1xf32> to vector<8x128xf32>
    %100 = vector.broadcast %98 : vector<1x128xf32> to vector<8x128xf32>
    %101 = arith.subf %99, %100 : vector<8x128xf32>
    %102 = math.absf %101 : vector<8x128xf32>
    %103 = arith.addf %89, %102 : vector<8x128xf32>
    %104 = vector.extract_strided_slice %31 {offsets = [0, 10], sizes = [8, 1], strides = [1, 1]} : vector<8x16xf32> to vector<8x1xf32>
    %c10 = arith.constant 10 : index
    %c0_25 = arith.constant 0 : index
    %105 = vector.load %arg2[%c10, %c0_25] : memref<16x128xf32, #tpu.memory_space<vmem>>, vector<1x128xf32>
    %106 = vector.broadcast %104 : vector<8x1xf32> to vector<8x128xf32>
    %107 = vector.broadcast %105 : vector<1x128xf32> to vector<8x128xf32>
    %108 = arith.subf %106, %107 : vector<8x128xf32>
    %109 = math.absf %108 : vector<8x128xf32>
    %110 = arith.addf %96, %109 : vector<8x128xf32>
    %111 = vector.extract_strided_slice %31 {offsets = [0, 11], sizes = [8, 1], strides = [1, 1]} : vector<8x16xf32> to vector<8x1xf32>
    %c11 = arith.constant 11 : index
    %c0_26 = arith.constant 0 : index
    %112 = vector.load %arg2[%c11, %c0_26] : memref<16x128xf32, #tpu.memory_space<vmem>>, vector<1x128xf32>
    %113 = vector.broadcast %111 : vector<8x1xf32> to vector<8x128xf32>
    %114 = vector.broadcast %112 : vector<1x128xf32> to vector<8x128xf32>
    %115 = arith.subf %113, %114 : vector<8x128xf32>
    %116 = math.absf %115 : vector<8x128xf32>
    %117 = arith.addf %103, %116 : vector<8x128xf32>
    %118 = vector.extract_strided_slice %31 {offsets = [0, 12], sizes = [8, 1], strides = [1, 1]} : vector<8x16xf32> to vector<8x1xf32>
    %c12 = arith.constant 12 : index
    %c0_27 = arith.constant 0 : index
    %119 = vector.load %arg2[%c12, %c0_27] : memref<16x128xf32, #tpu.memory_space<vmem>>, vector<1x128xf32>
    %120 = vector.broadcast %118 : vector<8x1xf32> to vector<8x128xf32>
    %121 = vector.broadcast %119 : vector<1x128xf32> to vector<8x128xf32>
    %122 = arith.subf %120, %121 : vector<8x128xf32>
    %123 = math.absf %122 : vector<8x128xf32>
    %124 = arith.addf %110, %123 : vector<8x128xf32>
    %125 = vector.extract_strided_slice %31 {offsets = [0, 13], sizes = [8, 1], strides = [1, 1]} : vector<8x16xf32> to vector<8x1xf32>
    %c13 = arith.constant 13 : index
    %c0_28 = arith.constant 0 : index
    %126 = vector.load %arg2[%c13, %c0_28] : memref<16x128xf32, #tpu.memory_space<vmem>>, vector<1x128xf32>
    %127 = vector.broadcast %125 : vector<8x1xf32> to vector<8x128xf32>
    %128 = vector.broadcast %126 : vector<1x128xf32> to vector<8x128xf32>
    %129 = arith.subf %127, %128 : vector<8x128xf32>
    %130 = math.absf %129 : vector<8x128xf32>
    %131 = arith.addf %117, %130 : vector<8x128xf32>
    %132 = vector.extract_strided_slice %31 {offsets = [0, 14], sizes = [8, 1], strides = [1, 1]} : vector<8x16xf32> to vector<8x1xf32>
    %c14 = arith.constant 14 : index
    %c0_29 = arith.constant 0 : index
    %133 = vector.load %arg2[%c14, %c0_29] : memref<16x128xf32, #tpu.memory_space<vmem>>, vector<1x128xf32>
    %134 = vector.broadcast %132 : vector<8x1xf32> to vector<8x128xf32>
    %135 = vector.broadcast %133 : vector<1x128xf32> to vector<8x128xf32>
    %136 = arith.subf %134, %135 : vector<8x128xf32>
    %137 = math.absf %136 : vector<8x128xf32>
    %138 = arith.addf %124, %137 : vector<8x128xf32>
    %139 = vector.extract_strided_slice %31 {offsets = [0, 15], sizes = [8, 1], strides = [1, 1]} : vector<8x16xf32> to vector<8x1xf32>
    %c15 = arith.constant 15 : index
    %c0_30 = arith.constant 0 : index
    %140 = vector.load %arg2[%c15, %c0_30] : memref<16x128xf32, #tpu.memory_space<vmem>>, vector<1x128xf32>
    %141 = vector.broadcast %139 : vector<8x1xf32> to vector<8x128xf32>
    %142 = vector.broadcast %140 : vector<1x128xf32> to vector<8x128xf32>
    %143 = arith.subf %141, %142 : vector<8x128xf32>
    %144 = math.absf %143 : vector<8x128xf32>
    %145 = arith.addf %131, %144 : vector<8x128xf32>
    %146 = arith.addf %138, %145 : vector<8x128xf32>
    %cst_31 = arith.constant 1.000000e+00 : f32
    %147 = vector.broadcast %cst_31 : f32 to vector<1x128xf32>
    %148 = arith.mulf %147, %30 : vector<1x128xf32>
    %cst_32 = arith.constant 1.000000e+00 : f32
    %149 = vector.broadcast %cst_32 : f32 to vector<8x128xf32>
    %150 = arith.mulf %149, %146 : vector<8x128xf32>
    %151 = vector.broadcast %148 : vector<1x128xf32> to vector<8x128xf32>
    %152 = arith.addf %151, %150 : vector<8x128xf32>
    %c0_33 = arith.constant 0 : index
    %c0_34 = arith.constant 0 : index
    %153 = vector.load %arg4[%c0_33, %c0_34] : memref<8x128xf32, #tpu.memory_space<vmem>>, vector<8x128xf32>
    tpu.vector_store %arg4[%c0_33, %c0_34], %152 {strides = array<i32>} : memref<8x128xf32, #tpu.memory_space<vmem>>, vector<8x128xf32>,
    return
  }
  func.func @transform_0(%arg0: i32) -> (i32, i32) {
    %c0_i32 = arith.constant 0 : i32
    %c0_i32_0 = arith.constant 0 : i32
    return %c0_i32, %arg0 : i32, i32
  }
  func.func @transform_1(%arg0: i32) -> (i32, i32) {
    %c0_i32 = arith.constant 0 : i32
    %c0_i32_0 = arith.constant 0 : i32
    return %c0_i32, %arg0 : i32, i32
  }
  func.func @transform_2(%arg0: i32) -> (i32, i32) {
    %c0_i32 = arith.constant 0 : i32
    %c0_i32_0 = arith.constant 0 : i32
    %c0_i32_1 = arith.constant 0 : i32
    return %c0_i32, %c0_i32_0 : i32, i32
  }
  func.func @transform_3(%arg0: i32) -> (i32, i32) {
    %c0_i32 = arith.constant 0 : i32
    %c0_i32_0 = arith.constant 0 : i32
    return %c0_i32, %arg0 : i32, i32
  }
}

</mosaic_0001>

<bundles_post_ra>
// kernel: _cost_matrix_device.1
= control target key start
LH: loop header
LB: loop body
LE: loop exit
PB: predicated region body
PF: predicated region fallthrough
CT: control target
= control target key end

     0   :  { %v338_v1 = vmov 2   ;;  %v339_v2 = vmov 0   ;;  %s432_s0 = inlined_call_operand.vmem [shape: f32[8,128], index: 0, kind: input, shape index: {}]   ;;  %s433_s1 = inlined_call_operand.vmem [shape: f32[16,128], index: 1, kind: input, shape index: {}]   ;;  %s434_s2 = inlined_call_operand.vmem [shape: f32[8,16], index: 2, kind: input, shape index: {}]   ;;  %s435_s3 = inlined_call_operand.hbm [shape: f32[8,128], index: 3, kind: output, shape index: {}]  }
   0x1   :  { %v46_v0 = vld [vmem:[%s434_s2] sm:$0xff]  ;;  %293 = vset.pattern.permute.xlu1 %v338_v1  ;;  %291 = vset.pattern.permute.xlu0 %v339_v2 }
   0x2   :  { %74 = vperm.xlu1 %293, %v46_v0   ;;  %50 = vperm.xlu0 %291, %v46_v0  }
   0x3   :  { %8 = vsyncpa [#allocation3], 0  ;;  %v340_v3 = vmov 3   ;;  %v341_v4 = vmov 1   ;;  %v342_v5 = vmov 4   ;;  %v343_v6 = vmov 5  }
   0x4   :  { %v344_v7 = vmov 6   ;;  %v345_v8 = vmov 8   ;;  %v346_v9 = vmov 7   ;;  %v347_v10 = vmov 11   ;;  %v15_v17 = vld [vmem:[%s432_s0] sm:$0xff]  ;;  %s354_s17 = smov [#allocation2]  }
   0x5   :  { %v348_v11 = vmov 9   ;;  %v349_v12 = vmov 14   ;;  %v350_v13 = vmov 10   ;;  %v351_v14 = vmov 15   ;;  %v260_v45 = vld [vmem:[%s433_s1 + $0x2] ss:$0 sm:$0xff] }
   0x6   :  { %294 = vset.pattern.permute.xlu1 %v340_v3  ;;  %292 = vset.pattern.permute.xlu0 %v341_v4  ;;  %v352_v15 = vmov 12   ;;  %v353_v16 = vmov 13   ;;  %v257_v18 = vmul.f32 -1.442695, %v15_v17  ;;  %v258_v46 = vld [vmem:[%s433_s1] ss:$0 sm:$0xff] }
   0x7   :  { %86 = vperm.xlu1 %294, %v46_v0   ;;  %62 = vperm.xlu0 %292, %v46_v0   ;;  %v262_v47 = vld [vmem:[%s433_s1 + $0x4] ss:$0 sm:$0xff]  ;;  %v261_v50 = vld [vmem:[%s433_s1 + $0x3] ss:$0 sm:$0xff]  ;;  %v259_v51 = vld [vmem:[%s433_s1 + $0x1] ss:$0 sm:$0xff] }
   0x8   :  { %308 = vpow2.f32 %v257_v18  ;;  %v264_v55 = vld [vmem:[%s433_s1 + $0x6] ss:$0 sm:$0xff]  ;;  %v263_v57 = vld [vmem:[%s433_s1 + $0x5] ss:$0 sm:$0xff]  ;;  %v265_v63 = vld [vmem:[%s433_s1 + $0x7] ss:$0 sm:$0xff] }
   0x9   :  { %v266_v2 = vld [vmem:[%s433_s1 + $0x8] ss:$0 sm:$0xff]  ;;  %v269_v18 = vld [vmem:[%s433_s1 + $0xb] ss:$0 sm:$0xff]  ;;  %s249_s18 = sshll.u32 %s354_s17, 4  ;;  %s250_s18 = int_to_ptr.vmem [resolvable:$true] %s249_s18 }
   0xa   :  { %p321_p1 = scmp.lt.s32.totalorder %s250_s18, %s250_s18 }
   0xb   :  { %295 = vset.pattern.permute.xlu1 %v342_v5  ;;  %296 = vset.pattern.permute.xlu0 %v343_v6  ;;  %v267_v6 = vld [vmem:[%s433_s1 + $0x9] ss:$0 sm:$0xff] }
   0xc   :  { %98 = vperm.xlu1 %295, %v46_v0   ;;  %110 = vperm.xlu0 %296, %v46_v0  }
  0x10   :  { %297 = vset.pattern.permute.xlu1 %v344_v7  ;;  %299 = vset.pattern.permute.xlu0 %v345_v8 }
  0x11   :  { %122 = vperm.xlu1 %297, %v46_v0   ;;  %146 = vperm.xlu0 %299, %v46_v0  }
  0x15   :  { %298 = vset.pattern.permute.xlu1 %v346_v9  ;;  %302 = vset.pattern.permute.xlu0 %v347_v10  ;;  %v309_v19 = vpop.eup %308 }
  0x16   :  { %134 = vperm.xlu1 %298, %v46_v0   ;;  %182 = vperm.xlu0 %302, %v46_v0   ;;  %v19_v20 = vadd.f32 1.0, %v309_v19 }
  0x18   :  { %310 = vrcp.f32 %v19_v20  ;;  %v270_v20 = vld [vmem:[%s433_s1 + $0xc] ss:$0 sm:$0xff] }
  0x1a   :  { %300 = vset.pattern.permute.xlu1 %v348_v11  ;;  %305 = vset.pattern.permute.xlu0 %v349_v12 }
  0x1b   :  { %158 = vperm.xlu1 %300, %v46_v0   ;;  %218 = vperm.xlu0 %305, %v46_v0  }
  0x1f   :  { %301 = vset.pattern.permute.xlu1 %v350_v13  ;;  %307 = vset.pattern.permute.xlu0 %v351_v14  ;;  %v268_v13 = vld [vmem:[%s433_s1 + $0xa] ss:$0 sm:$0xff] }
  0x20   :  { %170 = vperm.xlu1 %301, %v46_v0  }
  0x24   :  { %303 = vset.pattern.permute.xlu1 %v352_v15 }
  0x25   :  { %194 = vperm.xlu1 %303, %v46_v0   ;;  %v311_v21 = vpop.eup %310 }
  0x26   :  { %v22_v22 = vsub.f32 1.0, %v311_v21  ;;  %v32_v23 = vadd.f32 1e-08, %v311_v21  ;;  %v23_v29 = vmul.f32 %v311_v21, %v311_v21 }
  0x28   :  { %v25_v24 = vadd.f32 1e-08, %v22_v22  ;;  %312 = vlog2.f32 %v32_v23  ;;  %v30_v31 = vmul.f32 %v22_v22, %v22_v22  ;;  %v24_v34 = vmul.f32 0.75, %v23_v29 }
  0x29   :  { %304 = vset.pattern.permute.xlu1 %v353_v16 }
  0x2a   :  { %206 = vperm.xlu1 %304, %v46_v0   ;;  %314 = vlog2.f32 %v25_v24  ;;  %v31_v36 = vmul.f32 0.25, %v30_v31 }
  0x2e   :  { %306 = vset.pattern.permute.xlu1 %v351_v14 }
  0x2f   :  { %230 = vperm.xlu1 %306, %v46_v0  }
  0x35   :  { %v313_v26 = vpop.eup %312 }
  0x36   :  { %v34_v32 = vmul.f32 0.6931472, %v313_v26 }
  0x37   :  { %v315_v28 = vpop.eup %314 }
  0x38   :  { %v27_v30 = vmul.f32 0.6931472, %v315_v28  ;;  %v35_v37 = vsub.f32 0.0, %v34_v32  ;;  %v271_v32 = vld [vmem:[%s433_s1 + $0xd] ss:$0 sm:$0xff] }
  0x3a   :  { %v28_v35 = vsub.f32 0.0, %v27_v30  ;;  %v36_v41 = vmul.f32 %v35_v37, %v31_v36 }
  0x3c   :  { %v29_v40 = vmul.f32 %v28_v35, %v24_v34 }
  0x3e   :  { %v37_v44 = vsub.f32 %v36_v41, %v29_v40 }
  0x40   :  { %v38_v53 = vrot.slane %v37_v44, 4 }
  0x42   :  { %v39_v0 = vadd.f32 %v38_v53, %v37_v44 }
  0x44   :  { %v40_v14 = vrot.slane %v39_v0, 2 }
  0x7d   :  { %v75_v25 = vpop.permute.xlu1 %74  ;;  %v51_v38 = vpop.permute.xlu0 %50 }
  0x7e   :  { %v81_v48 = vsub.f32 %v75_v25, %v260_v45  ;;  %v57_v49 = vsub.f32 %v51_v38, %v258_v46  ;;  %v273_v45 = vld [vmem:[%s433_s1 + $0xf] ss:$0 sm:$0xff] }
  0x80   :  { %v82_v60 = vand.u32 2147483647, %v81_v48  ;;  %v58_v61 = vand.u32 2147483647, %v57_v49 }
  0x82   :  { %v87_v27 = vpop.permute.xlu1 %86  ;;  %v63_v42 = vpop.permute.xlu0 %62  ;;  %v83_v10 = vadd.f32 %v82_v60, %v58_v61 }
  0x83   :  { %v93_v58 = vsub.f32 %v87_v27, %v261_v50  ;;  %v69_v59 = vsub.f32 %v63_v42, %v259_v51  ;;  %v41_v27 = vadd.f32 %v40_v14, %v39_v0 }
  0x85   :  { %v94_v7 = vand.u32 2147483647, %v93_v58  ;;  %v70_v8 = vand.u32 2147483647, %v69_v59  ;;  %v42_v40 = vrot.slane %v41_v27, 1 }
  0x87   :  { %v99_v33 = vpop.permute.xlu1 %98  ;;  %v111_v54 = vpop.permute.xlu0 %110  ;;  %v95_v22 = vadd.f32 %v94_v7, %v70_v8  ;;  %v43_v49 = vadd.f32 %v42_v40, %v41_v27 }
  0x88   :  { %v105_v56 = vsub.f32 %v99_v33, %v262_v47  ;;  %v117_v1 = vsub.f32 %v111_v54, %v263_v57  ;;  %v272_v33 = vld [vmem:[%s433_s1 + $0xe] ss:$0 sm:$0xff]  ;;  %s316_s1 = scalar_lea.vmem %s250_s18, 128 }
  0x89   :  { %v45_v58 = vmul.f32 0.125, %v43_v49  ;;  %p317_p0 = scmp.ne.s32.totalorder %s250_s18, %s316_s1  ;;  %p322_p2 = scmp.lt.s32.totalorder %s316_s1, %s316_s1 }
  0x8a   :  { %v106_v5 = vand.u32 2147483647, %v105_v56  ;;  %v118_v15 = vand.u32 2147483647, %v117_v1 }
  0x8b   :  { %p323_p3 = por %p322_p2, %p321_p1 }
  0x8c   :  { %v123_v39 = vpop.permute.xlu1 %122  ;;  %v147_v3 = vpop.permute.xlu0 %146  ;;  %v107_v17 = vadd.f32 %v106_v5, %v83_v10  ;;  %v119_v28 = vadd.f32 %v118_v15, %v95_v22 }
  0x8d   :  { %v129_v62 = vsub.f32 %v123_v39, %v264_v55  ;;  %v153_v12 = vsub.f32 %v147_v3, %v266_v2  ;;  %p324_p4 = pnand %p323_p3, %p317_p0 }
  0x8f   :  { %v130_v11 = vand.u32 2147483647, %v129_v62  ;;  %v154_v26 = vand.u32 2147483647, %v153_v12 }
  0x91   :  { %v135_v43 = vpop.permute.xlu1 %134  ;;  %v183_v19 = vpop.permute.xlu0 %182  ;;  %v131_v25 = vadd.f32 %v130_v11, %v107_v17 }
  0x92   :  { %v141_v9 = vsub.f32 %v135_v43, %v265_v63  ;;  %v189_v30 = vsub.f32 %v183_v19, %v269_v18 }
  0x93   :  { %v155_v38 = vadd.f32 %v154_v26, %v131_v25 }
  0x94   :  { %v142_v23 = vand.u32 2147483647, %v141_v9  ;;  %v190_v42 = vand.u32 2147483647, %v189_v30 }
  0x96   :  { %v159_v52 = vpop.permute.xlu1 %158  ;;  %v219_v34 = vpop.permute.xlu0 %218  ;;  %v143_v35 = vadd.f32 %v142_v23, %v119_v28 }
  0x97   :  { %v165_v16 = vsub.f32 %v159_v52, %v267_v6  ;;  %v225_v44 = vsub.f32 %v219_v34, %v272_v33 }
  0x99   :  { %v166_v29 = vand.u32 2147483647, %v165_v16  ;;  %v226_v52 = vand.u32 2147483647, %v225_v44 }
  0x9b   :  { %v171_v4 = vpop.permute.xlu1 %170  ;;  %v167_v41 = vadd.f32 %v166_v29, %v143_v35 }
  0x9c   :  { %v177_v24 = vsub.f32 %v171_v4, %v268_v13 }
  0x9d   :  { %v191_v50 = vadd.f32 %v190_v42, %v167_v41 }
  0x9e   :  { %v178_v36 = vand.u32 2147483647, %v177_v24 }
  0xa0   :  { %v195_v21 = vpop.permute.xlu1 %194  ;;  %v179_v46 = vadd.f32 %v178_v36, %v155_v38 }
  0xa1   :  { %v201_v31 = vsub.f32 %v195_v21, %v270_v20 }
  0xa3   :  { %v202_v43 = vand.u32 2147483647, %v201_v31 }
  0xa5   :  { %v207_v37 = vpop.permute.xlu1 %206  ;;  %v203_v51 = vadd.f32 %v202_v43, %v179_v46 }
  0xa6   :  { %v213_v39 = vsub.f32 %v207_v37, %v271_v32 }
  0xa7   :  { %v227_v56 = vadd.f32 %v226_v52, %v203_v51 }
  0xa8   :  { %v214_v47 = vand.u32 2147483647, %v213_v39 }
  0xaa   :  { %v231_v48 = vpop.permute.xlu1 %230  ;;  %v215_v54 = vadd.f32 %v214_v47, %v191_v50 }
  0xab   :  { %v237_v53 = vsub.f32 %v231_v48, %v273_v45 }
  0xad   :  { %v238_v55 = vand.u32 2147483647, %v237_v53 }
  0xaf   :  { %v239_v57 = vadd.f32 %v238_v55, %v215_v54 }
  0xb1   :  { %v240_v59 = vadd.f32 %v239_v57, %v227_v56 }
  0xb3   :  { %v241_v60 = vadd.f32 %v240_v59, %v45_v58 }
  0xb5   :  { %242 = vst [vmem:[#allocation2] sm:$0xff] %v241_v60 }
  0xb6   :  { %327 = shalt.err (!%p324_p4)
}
  0xb7   :  { %252 = dma.vmem_to_hbm [thread:$0]  %s250_s18, 128, %s435_s3, [#allocation3]  }
  0xb8   :  { %336 = dma.done.wait [#allocation3], 128  }
  0xb9   :  { %337 = vsyncadd [#allocation3], 4294967168 }
  0xba   :  { %256 = vsyncpa [#allocation3], 1 }

</bundles_post_ra>
